<compile_context>
chip_gen: v7x
topology: tpu7x:2x2x1
jax: 0.10.0
libtpu: 0.0.40
codegen_flags: <defaults>
</compile_context>

<pallas_src>
import functools

import jax
import jax.numpy as jnp
from jax.experimental import pallas as pl
from jax.experimental.pallas import tpu as pltpu

IMAGE_CHANNEL = 3
NUM_CLASS = 256
BN_EPS = 1e-5


def _round_up(x, m):
    return (x + m - 1) // m * m


# ----------------------------------------------------------------------------
# Pallas kernel: tiled bf16 matmul (f32 acc) + fused scale/shift + activation.
# ----------------------------------------------------------------------------
def fused_matmul_kernel(x_ref, w_ref, scale_ref, shift_ref, o_ref, acc_ref,
                        *, alpha, sigmoid):
    @pl.when(pl.program_id(2) == 0)
    def _():
        acc_ref[...] = jnp.zeros_like(acc_ref)

    acc_ref[...] += jnp.dot(x_ref[...], w_ref[...],
                            preferred_element_type=jnp.float32)

    @pl.when(pl.program_id(2) == pl.num_programs(2) - 1)
    def _():
        # Epilogue in f32 (cheap VPU filler on all generations); cast on store.
        y = acc_ref[...] * scale_ref[...] + shift_ref[...]
        if alpha is not None:                       # LeakyReLU
            y = jnp.where(y >= 0, y, alpha * y)
        if sigmoid:
            y = 1.0 / (1.0 + jnp.exp(-y))
        o_ref[...] = y.astype(o_ref.dtype)


def _pad_kn(K, N):
    """Padded (Kp, Np) used both for weight prep (init) and x padding (fwd)."""
    Kp = K if K < 128 else _round_up(K, 128)
    if Kp > 2048:
        Kp = _round_up(Kp, 2048)        # tk = 2048 => K multiple of 2048
    Np = _round_up(N, 128)
    return Kp, Np


def fused_matmul(x, wp, scale_p, shift_p, n_out, *, alpha=None, sigmoid=False,
                 out_dtype=jnp.float32):
    """act(scale * (x @ w) + shift)[:, :n_out].

    x:       (M, K)   any float dtype (cast to bf16 here)
    wp:      (Kp, Np) bf16, pre-padded / pre-transposed at init
    scale_p: (1, Np)  f32
    shift_p: (1, Np)  f32
    """
    M, K = x.shape
    Kp, Np = wp.shape

    # Tile selection (see header).  bf16 min sublane tile is (16, 128).
    tm = 256 if M >= 256 else _round_up(M, 16)
    Mp = _round_up(M, tm)
    tk = Kp if Kp <= 2048 else 2048
    tn = min(512, Np)

    xp = x.astype(jnp.bfloat16)
    if (Mp, Kp) != (M, K):
        xp = jnp.pad(xp, ((0, Mp - M), (0, Kp - K)))

    kernel = functools.partial(fused_matmul_kernel, alpha=alpha, sigmoid=sigmoid)

    out = pl.pallas_call(
        kernel,
        out_shape=jax.ShapeDtypeStruct((Mp, Np), out_dtype),
        grid_spec=pltpu.PrefetchScalarGridSpec(
            num_scalar_prefetch=0,
            grid=(Mp // tm, Np // tn, Kp // tk),
            in_specs=[
                pl.BlockSpec((tm, tk), lambda i, j, k: (i, k)),
                pl.BlockSpec((tk, tn), lambda i, j, k: (k, j)),
                pl.BlockSpec((1, tn), lambda i, j, k: (0, j)),
                pl.BlockSpec((1, tn), lambda i, j, k: (0, j)),
            ],
            out_specs=pl.BlockSpec((tm, tn), lambda i, j, k: (i, j)),
            scratch_shapes=[pltpu.VMEM((tm, tn), jnp.float32)],
        ),
        compiler_params=pltpu.CompilerParams(
            dimension_semantics=("parallel", "parallel", "arbitrary")),
    )(xp, wp, scale_p, shift_p)

    return out[:M, :n_out]


# ----------------------------------------------------------------------------
# im2col glue (plain JAX, NHWC, bf16): conv -> matmul operand.
# TODO(synk): patch gather is not fused into the Pallas kernel (would need
# manual DMA / Element index_map); it is kept as bf16 XLA slicing glue.
# ----------------------------------------------------------------------------
def im2col_nhwc(x, k, stride, pad):
    """x: (N, H, W, C) -> (N*Ho*Wo, k*k*C) with (kh, kw, ci) feature order."""
    n, h, w, c = x.shape
    xp = jnp.pad(x, ((0, 0), (pad, pad), (pad, pad), (0, 0)))
    ho = (h + 2 * pad - k) // stride + 1
    wo = (w + 2 * pad - k) // stride + 1
    cols = []
    for i in range(k):
        for j in range(k):
            cols.append(xp[:, i:i + stride * ho:stride,
                           j:j + stride * wo:stride, :])
    col = jnp.stack(cols, axis=3)                    # (N, Ho, Wo, k*k, C)
    col = col.reshape(n * ho * wo, k * k * c)        # rows already (n,ho,wo)
    return col, ho, wo


def conv_block(x_nhwc, layer, cout, *, k, stride, pad, alpha,
               out_dtype=jnp.bfloat16):
    """Conv2d (bias=False) + fused per-channel affine (BN) + optional LeakyReLU.

    Input and output stay NHWC; matmul output rows are already (n, ho, wo)
    ordered so the reshape back is free (no transpose)."""
    n = x_nhwc.shape[0]
    col, ho, wo = im2col_nhwc(x_nhwc, k, stride, pad)
    out = fused_matmul(col, layer["w"], layer["scale"], layer["shift"], cout,
                       alpha=alpha, out_dtype=out_dtype)
    return out.reshape(n, ho, wo, cout)


# ----------------------------------------------------------------------------
# Parameter construction (deterministic, matches initialize_weights()).
# Weights are stored in padded (Kp, Np) bf16 matmul form; BN folded into a
# per-channel (scale, shift) pair, padded to (1, Np) f32.
# ----------------------------------------------------------------------------
def _prep_layer(w2d, scale, shift):
    K, N = w2d.shape
    Kp, Np = _pad_kn(K, N)
    wp = jnp.pad(w2d, ((0, Kp - K), (0, Np - N))).astype(jnp.bfloat16)
    sp = jnp.pad(scale.astype(jnp.float32), (0, Np - N)).reshape(1, Np)
    bp = jnp.pad(shift.astype(jnp.float32), (0, Np - N)).reshape(1, Np)
    return {"w": wp, "scale": sp, "shift": bp}


def init_params(key):
    conv_specs = [
        ("conv1", IMAGE_CHANNEL, 64, True),
        ("conv2", 64, 128, True),
        ("conv3", 128, 256, True),
        ("conv4", 256, 512, True),
        ("conv5", 512, 1024, True),
        ("conv6", 1024, 1024, False),
    ]
    params = {}
    keys = jax.random.split(key, len(conv_specs) + 2)
    bn_scale = 1.0 / jnp.sqrt(1.0 + BN_EPS)          # eval-mode BN, fresh init
    for (name, cin, cout, has_bn), kk in zip(conv_specs, keys[:len(conv_specs)]):
        w = 0.02 * jax.random.normal(kk, (cout, cin, 4, 4), dtype=jnp.float32)
        # (Cout, Cin, kh, kw) -> (kh, kw, Cin, Cout) -> (kh*kw*Cin, Cout),
        # matching the (kh, kw, ci) feature order produced by im2col_nhwc.
        w2d = w.transpose(2, 3, 1, 0).reshape(4 * 4 * cin, cout)
        scale = jnp.full((cout,), bn_scale if has_bn else 1.0, jnp.float32)
        shift = jnp.zeros((cout,), jnp.float32)
        params[name] = _prep_layer(w2d, scale, shift)

    # Linear layers: torch stores (out, in); generate the (in, out) matmul form.
    w_fc1 = 0.02 * jax.random.normal(keys[-2], (1024 + NUM_CLASS, 256),
                                     dtype=jnp.float32)
    params["fc1"] = _prep_layer(w_fc1, jnp.ones((256,), jnp.float32),
                                jnp.zeros((256,), jnp.float32))
    w_fc2 = 0.02 * jax.random.normal(keys[-1], (256, 1), dtype=jnp.float32)
    params["fc2"] = _prep_layer(w_fc2, jnp.ones((1,), jnp.float32),
                                jnp.zeros((1,), jnp.float32))
    return params


# ----------------------------------------------------------------------------
# Full Discriminator forward.
# ----------------------------------------------------------------------------
def discriminator_forward(params, image, label):
    # Single NCHW -> NHWC relayout of the input; everything else stays NHWC.
    x = jnp.transpose(image, (0, 2, 3, 1)).astype(jnp.bfloat16)

    for name, cout, stride, pad, alpha in [
        ("conv1", 64, 2, 1, 0.2),
        ("conv2", 128, 2, 1, 0.2),
        ("conv3", 256, 2, 1, 0.2),
        ("conv4", 512, 2, 1, 0.2),
        ("conv5", 1024, 2, 1, 0.2),
        ("conv6", 1024, 1, 0, None),     # conv6: no BN, no activation
    ]:
        x = conv_block(x, params[name], cout, k=4, stride=stride, pad=pad,
                       alpha=alpha, out_dtype=jnp.bfloat16)

    # x: (N, 1, 1, 1024) -> (N, 1024)   (spatial is 1x1, so layout-equivalent
    # to torch's x.view(-1, 1024))
    n = x.shape[0]
    x = x.reshape(n, 1024)
    x = jnp.concatenate([x, label.astype(x.dtype)], axis=1)   # (N, 1280)

    x = fused_matmul(x, params["fc1"]["w"], params["fc1"]["scale"],
                     params["fc1"]["shift"], 256, alpha=0.1,
                     out_dtype=jnp.bfloat16)
    x = fused_matmul(x, params["fc2"]["w"], params["fc2"]["scale"],
                     params["fc2"]["shift"], 1, sigmoid=True,
                     out_dtype=jnp.float32)
    return x                                                  # (N, 1)


if __name__ == "__main__":
    key = jax.random.PRNGKey(0)
    kp, ki, kl, kt1, kt2 = jax.random.split(key, 5)

    # --- quick numerical self-check of the fused kernel vs plain-JAX ref ----
    xs = jax.random.normal(kt1, (32, 48), dtype=jnp.float32)
    ws = 0.02 * jax.random.normal(kt2, (48, 64), dtype=jnp.float32)
    lyr = _prep_layer(ws, jnp.ones((64,), jnp.float32),
                      jnp.zeros((64,), jnp.float32))
    got = fused_matmul(xs, lyr["w"], lyr["scale"], lyr["shift"], 64, alpha=0.2)
    ref = jnp.dot(xs.astype(jnp.bfloat16).astype(jnp.float32),
                  jnp.asarray(lyr["w"][:48, :64], jnp.float32))
    ref = jnp.where(ref >= 0, ref, 0.2 * ref)
    got = jax.block_until_ready(got)
    assert float(jnp.max(jnp.abs(got - ref))) < 1e-2

    # --- full forward ------------------------------------------------------
    params = init_params(kp)

    # 128x128 input is required by the architecture (conv6 reduces 4x4 -> 1x1).
    batch = 2
    image = jax.random.normal(ki, (batch, IMAGE_CHANNEL, 128, 128),
                              dtype=jnp.float32)
    label_idx = jax.random.randint(kl, (batch,), 0, NUM_CLASS)
    label = jax.nn.one_hot(label_idx, NUM_CLASS, dtype=jnp.float32)

    fwd = jax.jit(discriminator_forward)
    out = fwd(params, image, label)
    out = jax.block_until_ready(out)

    assert out.shape == (batch, 1), out.shape
    assert bool(jnp.all(jnp.isfinite(out)))
    assert bool(jnp.all((out >= 0.0) & (out <= 1.0)))   # sigmoid output range
    print("KERNEL_OK")
</pallas_src>

<mosaic_0001>
module attributes {stable_mosaic.version = 11 : i64} {
  func.func @fused_matmul_kernel(%arg0: i32, %arg1: i32, %arg2: i32, %arg3: memref<32x48xbf16, #tpu.memory_space<vmem>>, %arg4: memref<48x128xbf16, #tpu.memory_space<vmem>>, %arg5: memref<1x128xf32, #tpu.memory_space<vmem>>, %arg6: memref<1x128xf32, #tpu.memory_space<vmem>>, %arg7: memref<32x128xf32, #tpu.memory_space<vmem>>, %arg8: memref<32x128xf32, #tpu.memory_space<vmem>>) attributes {dimension_semantics = [#tpu.dimension_semantics<parallel>, #tpu.dimension_semantics<parallel>, #tpu.dimension_semantics<arbitrary>], iteration_bounds = array<i64: 1, 1, 1>, scalar_prefetch = 0 : i64, scratch_operands = 1 : i64, tpu.core_type = #tpu.core_type<tc>, window_params = [{transform_indices = @transform_0, window_bounds = array<i64: 32, 48>}, {transform_indices = @transform_1, window_bounds = array<i64: 48, 128>}, {transform_indices = @transform_2, window_bounds = array<i64: 1, 128>}, {transform_indices = @transform_3, window_bounds = array<i64: 1, 128>}, {transform_indices = @transform_4, window_bounds = array<i64: 32, 128>}]} {
    %c0_i32 = arith.constant 0 : i32
    %0 = arith.cmpi eq, %arg2, %c0_i32 : i32
    %1 = arith.extui %0 : i1 to i32
    %c0_i32_0 = arith.constant 0 : i32
    %2 = arith.cmpi ne, %1, %c0_i32_0 : i32
    scf.if %2 {
      %cst_10 = arith.constant 0.000000e+00 : f32
      %12 = vector.broadcast %cst_10 : f32 to vector<32x128xf32>
      %c0_11 = arith.constant 0 : index
      %c0_12 = arith.constant 0 : index
      %13 = vector.load %arg8[%c0_11, %c0_12] : memref<32x128xf32, #tpu.memory_space<vmem>>, vector<32x128xf32>
      tpu.vector_store %arg8[%c0_11, %c0_12], %12 {strides = array<i32>} : memref<32x128xf32, #tpu.memory_space<vmem>>, vector<32x128xf32>,
    } else {
    }
    %c0 = arith.constant 0 : index
    %c0_1 = arith.constant 0 : index
    %3 = vector.load %arg8[%c0, %c0_1] : memref<32x128xf32, #tpu.memory_space<vmem>>, vector<32x128xf32>
    %c0_2 = arith.constant 0 : index
    %c0_3 = arith.constant 0 : index
    %4 = vector.load %arg3[%c0_2, %c0_3] : memref<32x48xbf16, #tpu.memory_space<vmem>>, vector<32x48xbf16>
    %c0_4 = arith.constant 0 : index
    %c0_5 = arith.constant 0 : index
    %5 = vector.load %arg4[%c0_4, %c0_5] : memref<48x128xbf16, #tpu.memory_space<vmem>>, vector<48x128xbf16>
    %cst = arith.constant dense<0.000000e+00> : vector<32x128xf32>
    %6 = tpu.matmul %4, %5, %cst {dimension_numbers = #tpu.dot_dimension_numbers<[1], [0], [0], [1], [0, 0, 1, 1], [], []>} : vector<32x48xbf16>, vector<48x128xbf16>, vector<32x128xf32> -> vector<32x128xf32>
    %7 = arith.addf %3, %6 : vector<32x128xf32>
    %c0_6 = arith.constant 0 : index
    %c0_7 = arith.constant 0 : index
    %8 = vector.load %arg8[%c0_6, %c0_7] : memref<32x128xf32, #tpu.memory_space<vmem>>, vector<32x128xf32>
    tpu.vector_store %arg8[%c0_6, %c0_7], %7 {strides = array<i32>} : memref<32x128xf32, #tpu.memory_space<vmem>>, vector<32x128xf32>,
    %c0_i32_8 = arith.constant 0 : i32
    %9 = arith.cmpi eq, %arg2, %c0_i32_8 : i32
    %10 = arith.extui %9 : i1 to i32
    %c0_i32_9 = arith.constant 0 : i32
    %11 = arith.cmpi ne, %10, %c0_i32_9 : i32
    scf.if %11 {
      %c0_10 = arith.constant 0 : index
      %c0_11 = arith.constant 0 : index
      %12 = vector.load %arg8[%c0_10, %c0_11] : memref<32x128xf32, #tpu.memory_space<vmem>>, vector<32x128xf32>
      %c0_12 = arith.constant 0 : index
      %c0_13 = arith.constant 0 : index
      %13 = vector.load %arg5[%c0_12, %c0_13] : memref<1x128xf32, #tpu.memory_space<vmem>>, vector<1x128xf32>
      %14 = vector.broadcast %13 : vector<1x128xf32> to vector<32x128xf32>
      %15 = arith.mulf %12, %14 : vector<32x128xf32>
      %c0_14 = arith.constant 0 : index
      %c0_15 = arith.constant 0 : index
      %16 = vector.load %arg6[%c0_14, %c0_15] : memref<1x128xf32, #tpu.memory_space<vmem>>, vector<1x128xf32>
      %17 = vector.broadcast %16 : vector<1x128xf32> to vector<32x128xf32>
      %18 = arith.addf %15, %17 : vector<32x128xf32>
      %cst_16 = arith.constant 0.000000e+00 : f32
      %19 = vector.broadcast %cst_16 : f32 to vector<32x128xf32>
      %20 = arith.cmpf oge, %18, %19 : vector<32x128xf32>
      %cst_17 = arith.constant 2.000000e-01 : f32
      %21 = vector.broadcast %cst_17 : f32 to vector<32x128xf32>
      %22 = arith.mulf %21, %18 : vector<32x128xf32>
      %23 = arith.select %20, %18, %22 : vector<32x128xi1>, vector<32x128xf32>
      %c0_18 = arith.constant 0 : index
      %c0_19 = arith.constant 0 : index
      %24 = vector.load %arg7[%c0_18, %c0_19] : memref<32x128xf32, #tpu.memory_space<vmem>>, vector<32x128xf32>
      tpu.vector_store %arg7[%c0_18, %c0_19], %23 {strides = array<i32>} : memref<32x128xf32, #tpu.memory_space<vmem>>, vector<32x128xf32>,
    } else {
    }
    return
  }
  func.func @transform_0(%arg0: i32, %arg1: i32, %arg2: i32) -> (i32, i32) {
    %c0_i32 = arith.constant 0 : i32
    return %arg0, %arg2 : i32, i32
  }
  func.func @transform_1(%arg0: i32, %arg1: i32, %arg2: i32) -> (i32, i32) {
    %c0_i32 = arith.constant 0 : i32
    return %arg2, %arg1 : i32, i32
  }
  func.func @transform_2(%arg0: i32, %arg1: i32, %arg2: i32) -> (i32, i32) {
    %c0_i32 = arith.constant 0 : i32
    %c0_i32_0 = arith.constant 0 : i32
    return %c0_i32, %arg1 : i32, i32
  }
  func.func @transform_3(%arg0: i32, %arg1: i32, %arg2: i32) -> (i32, i32) {
    %c0_i32 = arith.constant 0 : i32
    %c0_i32_0 = arith.constant 0 : i32
    return %c0_i32, %arg1 : i32, i32
  }
  func.func @transform_4(%arg0: i32, %arg1: i32, %arg2: i32) -> (i32, i32) {
    %c0_i32 = arith.constant 0 : i32
    return %arg0, %arg1 : i32, i32
  }
}

</mosaic_0001>

<bundles_post_ra>
// kernel: tpu_custom_call.1
= control target key start
LH: loop header
LB: loop body
LE: loop exit
PB: predicated region body
PF: predicated region fallthrough
CT: control target
= control target key end

     0   :  { %9 = vsyncpa [#allocation4], 0  ;;  %s406_s0 = inlined_call_operand.hbm [shape: bf16[32,48], index: 0, kind: input, shape index: {}]   ;;  %s407_s1 = inlined_call_operand.hbm [shape: bf16[48,128], index: 1, kind: input, shape index: {}]   ;;  %s408_s2 = inlined_call_operand.vmem [shape: f32[1,128], index: 2, kind: input, shape index: {}]   ;;  %s409_s3 = inlined_call_operand.vmem [shape: f32[1,128], index: 3, kind: input, shape index: {}]   ;;  %s410_s4 = inlined_call_operand.hbm [shape: f32[32,128], index: 4, kind: output, shape index: {}]  }
   0x1   :  { %10 = vsyncpa [#allocation7], 0 }
   0x2   :  { %11 = vsyncpa [#allocation5], 0  ;;  %s332_s15 = smov [#allocation3]   ;;  %s260_s19 = scalar_lea.hbm %s406_s0, 256 }
   0x3   :  { %s17_s16 = sshll.u32 %s332_s15, 4  ;;  %p261_p0 = scmp.ne.s32.totalorder %s406_s0, %s260_s19  ;;  %s18_s16 = int_to_ptr.vmem [resolvable:$true] %s17_s16 }
   0x4   :  { %p264_p1 = scmp.lt.u32.totalorder %s260_s19, %s406_s0 }
   0x6   :  { %p266_p2 = pnand %p264_p1, %p261_p0 }
   0x8   :  { %269 = shalt.err (!%p266_p2)
}
   0x9   :  { %s270_s24 = scalar_lea.vmem %s18_s16, 256  ;;  %p275_p4 = scmp.lt.s32.totalorder %s18_s16, %s18_s16 }
   0xa   :  { %p271_p3 = scmp.ne.s32.totalorder %s18_s16, %s270_s24  ;;  %p276_p5 = scmp.lt.s32.totalorder %s270_s24, %s270_s24 }
   0xc   :  { %p277_p6 = por %p276_p5, %p275_p4 }
   0xe   :  { %p278_p7 = pnand %p277_p6, %p271_p3 }
  0x10   :  { %281 = shalt.err (!%p278_p7)
}
  0x11   :  { %s333_s25 = smov 64   ;;  %s334_s26 = smov 4  }
  0x12   :  { %23 = dma.hbm_to_vmem [thread:$0]  %s406_s0, 256, %s18_s16, [#allocation4], %s333_s25, %s333_s25, %s334_s26  }
  0x13   :  { %s335_s29 = smov [#allocation6]   ;;  %s282_s7 = scalar_lea.hbm %s407_s1, 384 }
  0x14   :  { %s29_s30 = sshll.u32 %s335_s29, 4  ;;  %p283_p8 = scmp.ne.s32.totalorder %s407_s1, %s282_s7  ;;  %s30_s30 = int_to_ptr.vmem [resolvable:$true] %s29_s30 }
  0x15   :  { %p286_p9 = scmp.lt.u32.totalorder %s282_s7, %s407_s1 }
  0x17   :  { %p288_p10 = pnand %p286_p9, %p283_p8 }
  0x19   :  { %291 = shalt.err (!%p288_p10)
}
  0x1a   :  { %s292_s12 = scalar_lea.vmem %s30_s30, 384  ;;  %p297_p12 = scmp.lt.s32.totalorder %s30_s30, %s30_s30 }
  0x1b   :  { %p293_p11 = scmp.ne.s32.totalorder %s30_s30, %s292_s12  ;;  %p298_p13 = scmp.lt.s32.totalorder %s292_s12, %s292_s12 }
  0x1d   :  { %p299_p0 = por %p298_p13, %p297_p12 }
  0x1f   :  { %p300_p1 = pnand %p299_p0, %p293_p11 }
  0x21   :  { %303 = shalt.err (!%p300_p1)
}
  0x22   :  { %35 = dma.hbm_to_vmem [thread:$0]  %s407_s1, 384, %s30_s30, [#allocation7], %s333_s25, %s333_s25, %s334_s26  }
  0x23   :  { %326 = dma.done.wait [#allocation4], 256  }
  0x24   :  { %327 = vsyncadd [#allocation4], 4294967040 }
  0x25   :  { %328 = dma.done.wait [#allocation7], 384  }
  0x26   :  { %329 = vsyncadd [#allocation7], 4294966912  ;;  %v255_v0 = vld [vmem:[#allocation6] sm:$0xff]   ;;  %v256_v1 = vld [vmem:[#allocation6 + $0x8] sm:$0xff]   ;;  %vm97_vm0 = vcmask 392192   ;;  %s336_s17 = smov [#allocation8]  }
  0x27   :  { %238 = vmatprep.subr.bf16.mxu0 %v255_v0  ;;  %v258_v2 = vld [vmem:[#allocation3] sm:$0xff]   ;;  %v259_v4 = vld [vmem:[#allocation3 + $0x8] sm:$0xff]   ;;  %s211_s18 = sshll.u32 %s336_s17, 4  ;;  %s212_s18 = int_to_ptr.vmem [resolvable:$true] %s211_s18 }
  0x28   :  { %239 = vmatpush3.bf16.msra.mxu0 %v255_v0  ;;  %v257_v3 = vld [vmem:[#allocation6 + $0x10] sm:$0xff]   ;;  %244 = vmatprep.mubr.msk.bf16.mxu0 %vm97_vm0, %v258_v2  ;;  %p309_p3 = scmp.lt.s32.totalorder %s212_s18, %s212_s18 }
  0x29   :  { %240 = vmatprep.subr.bf16.mxu0 %v256_v1  ;;  %v231_v5 = vld [vmem:[%s408_s2] ss:$0 sm:$0xff]  ;;  %s304_s2 = scalar_lea.vmem %s212_s18, 512 }
  0x2a   :  { %v232_v7 = vld [vmem:[%s409_s3] ss:$0 sm:$0xff]  ;;  %p305_p2 = scmp.ne.s32.totalorder %s212_s18, %s304_s2  ;;  %p310_p4 = scmp.lt.s32.totalorder %s304_s2, %s304_s2 }
  0x2c   :  { %241 = vmatpush3.bf16.msra.mxu0 %v256_v1  ;;  %p311_p5 = por %p310_p4, %p309_p3 }
  0x2d   :  { %242 = vmatprep.subr.bf16.mxu0 %v257_v3 }
  0x2e   :  { %p312_p6 = pnand %p311_p5, %p305_p2 }
  0x30   :  { %243 = vmatpush3.bf16.msra.mxu0 %v257_v3 }
  0x33   :  { %245 = vmatmul.mubr.msk.bf16.vlgmr.msra.gmra.mrb[0].mxu0 %vm97_vm0, %v259_v4 }
 0x106   :  { %v246_v6 = vpop.f32.mrb[0].mxu0 }
 0x107   :  { %v177_v8 = vmul.f32 %v246_v6, %v231_v5  ;;  %v138_v9 = vpop.f32.mrb[1].mxu0 }
 0x108   :  { %v175_v10 = vmul.f32 %v231_v5, %v138_v9  ;;  %v247_v11 = vpop.f32.mrb[2].mxu0 }
 0x109   :  { %v188_v12 = vadd.f32 %v232_v7, %v177_v8  ;;  %v178_v13 = vmul.f32 %v247_v11, %v231_v5  ;;  %v141_v14 = vpop.f32.mrb[3].mxu0 }
 0x10a   :  { %v186_v15 = vadd.f32 %v232_v7, %v175_v10  ;;  %v176_v16 = vmul.f32 %v231_v5, %v141_v14 }
 0x10b   :  { %vm192_vm1 = vcmp.ge.f32.partialorder %v188_v12, 0.0  ;;  %v196_v17 = vmul.f32 0.2, %v188_v12  ;;  %v189_v18 = vadd.f32 %v232_v7, %v178_v13 }
 0x10c   :  { %vm190_vm2 = vcmp.ge.f32.partialorder %v186_v15, 0.0  ;;  %v194_v19 = vmul.f32 0.2, %v186_v15  ;;  %v187_v20 = vadd.f32 %v232_v7, %v176_v16 }
 0x10d   :  { %v200_v21 = vsel %vm192_vm1, %v188_v12, %v196_v17  ;;  %vm193_vm3 = vcmp.ge.f32.partialorder %v189_v18, 0.0  ;;  %v197_v22 = vmul.f32 0.2, %v189_v18 }
 0x10e   :  { %204 = vst [vmem:[#allocation8 + $0x10] sm:$0xff] %v200_v21  ;;  %v198_v23 = vsel %vm190_vm2, %v186_v15, %v194_v19  ;;  %vm191_vm4 = vcmp.ge.f32.partialorder %v187_v20, 0.0  ;;  %v195_v24 = vmul.f32 0.2, %v187_v20 }
 0x10f   :  { %202 = vst [vmem:[#allocation8] sm:$0xff] %v198_v23  ;;  %v201_v25 = vsel %vm193_vm3, %v189_v18, %v197_v22 }
 0x110   :  { %205 = vst [vmem:[#allocation8 + $0x18] sm:$0xff] %v201_v25  ;;  %v199_v26 = vsel %vm191_vm4, %v187_v20, %v195_v24 }
 0x111   :  { %203 = vst [vmem:[#allocation8 + $0x8] sm:$0xff] %v199_v26 }
 0x112   :  { %315 = shalt.err (!%p312_p6)
}
 0x113   :  { %s316_s20 = scalar_lea.hbm %s410_s4, 512 }
 0x114   :  { %p317_p7 = scmp.ne.s32.totalorder %s410_s4, %s316_s20  ;;  %p320_p8 = scmp.lt.u32.totalorder %s316_s20, %s410_s4 }
 0x116   :  { %p322_p9 = pnand %p320_p8, %p317_p7 }
 0x118   :  { %325 = shalt.err (!%p322_p9)
}
 0x119   :  { %s337_s25 = smov 128   ;;  %s338_s26 = smov 8  }
 0x11a   :  { %217 = dma.vmem_to_hbm [thread:$0]  %s212_s18, 512, %s410_s4, [#allocation5], %s337_s25, %s337_s25, %s338_s26  }
 0x11b   :  { %330 = dma.done.wait [#allocation5], 512  }
 0x11c   :  { %331 = vsyncadd [#allocation5], 4294966784 }
 0x11d   :  { %221 = vsyncpa [#allocation4], 1 }
 0x11e   :  { %222 = vsyncpa [#allocation7], 1 }
 0x11f   :  { %223 = vsyncpa [#allocation5], 1 }

</bundles_post_ra>
